<compile_context>
chip_gen: v7x
topology: tpu7x:2x2x1
jax: 0.10.0
libtpu: 0.0.40
codegen_flags: <defaults>
</compile_context>

<pallas_src>
import jax
import jax.numpy as jnp
from jax.experimental import pallas as pl
from jax.experimental.pallas import tpu as pltpu

EPS = 1e-07
_LANE = 128


def _make_kernel(C, T, tr, P_true, needs_mask):
    """Build the kernel for static channel count C, tiles-per-group T, tile rows tr."""
    two_class = (C == 2)

    def kernel(pred_ref, tgt_ref, out_ref, acc_xe, acc_in, acc_un):
        # pred_ref: (C, tr, 128) native-dtype logits
        # tgt_ref : (tr, 128)    int labels (pad value irrelevant; index-masked)
        # out_ref : (3, 128)     per-(sample, group) lane-partial sums
        # acc_*   : (1, 128)     f32 running partial sums across the row axis
        r = pl.program_id(2)

        @pl.when(r == 0)
        def _():
            acc_xe[...] = jnp.zeros_like(acc_xe)
            acc_in[...] = jnp.zeros_like(acc_in)
            acc_un[...] = jnp.zeros_like(acc_un)

        t_i = tgt_ref[...].astype(jnp.int32)              # (tr, 128)
        tf = t_i.astype(jnp.float32)                      # dice uses raw label value

        if needs_mask:
            # Pixel-index validity mask: handles both the 128-lane pad and the
            # ragged (garbage-filled) last row-tile.
            tile = pl.program_id(1) * T + r
            base = tile * (tr * _LANE)
            rows = jax.lax.broadcasted_iota(jnp.int32, (tr, _LANE), 0)
            lanes = jax.lax.broadcasted_iota(jnp.int32, (tr, _LANE), 1)
            valid_b = (base + rows * _LANE + lanes) < P_true
            valid = valid_b.astype(jnp.float32)
            tf = tf * valid

        if two_class:
            # Binary fast path: stable softplus/sigmoid form, no iota / no divide.
            d = pred_ref[1].astype(jnp.float32) - pred_ref[0].astype(jnp.float32)
            if needs_mask:
                d = jnp.where(valid_b, d, 0.0)            # NaN-safe in garbage rows
            sp = jnp.maximum(d, 0.0) + jnp.log(1.0 + jnp.exp(-jnp.abs(d)))
            nll = sp - tf * d                             # lse - logit_target
            p1 = jnp.exp(d - sp)                          # sigmoid(d), exact & stable
        else:
            # General C: small unrolled channel loop, no (C,tr,128) iota temporary.
            xs = [pred_ref[c].astype(jnp.float32) for c in range(C)]
            if needs_mask:
                xs = [jnp.where(valid_b, x, 0.0) for x in xs]
            m = xs[0]
            for c in range(1, C):
                m = jnp.maximum(m, xs[c])
            denom = jnp.zeros_like(m)
            logit_t = jnp.zeros_like(m)
            e1 = None
            for c in range(C):
                ec = jnp.exp(xs[c] - m)
                denom = denom + ec
                if c == 1:
                    e1 = ec
                logit_t = logit_t + jnp.where(t_i == c, xs[c], 0.0)
            nll = (m + jnp.log(denom)) - logit_t
            p1 = e1 / denom                               # exact (keeps 1e-5 accuracy)

        if needs_mask:
            nll = nll * valid
            un = (p1 + tf) * valid
        else:
            un = p1 + tf
        inter = p1 * tf

        # Per-step sublane reduce (XLU slot) into tiny (1,128) accumulators.
        acc_xe[...] += jnp.sum(nll, axis=0, keepdims=True)
        acc_in[...] += jnp.sum(inter, axis=0, keepdims=True)
        acc_un[...] += jnp.sum(un, axis=0, keepdims=True)

        @pl.when(r == pl.num_programs(2) - 1)
        def _():
            out_ref[0:1, :] = acc_xe[...]
            out_ref[1:2, :] = acc_in[...]
            out_ref[2:3, :] = acc_un[...]

    return kernel


def _pick_block_rows(n_rows, n_ch, itemsize, max_rows=2048, max_block_bytes=2 << 20):
    """Rows (sublane extent) per block: as large as possible with the preds block
    around ~2 MiB, so double-buffered inputs + f32 temporaries stay well under
    v5e's 16 MiB scoped default (raised explicitly) and v7x's 64 MiB VMEM."""
    cap = max_block_bytes // (n_ch * _LANE * itemsize)
    cap = max(32, (cap // 32) * 32)
    cap = min(cap, max_rows)
    return n_rows if n_rows <= cap else cap


def xe_dice_loss(preds, targets, alpha=0.5, block_rows=None):
    """preds: (N, C, H, W) logits (any float dtype); targets: (N, H, W) int labels."""
    N, C, H, W = preds.shape
    P = H * W
    P_pad = pl.cdiv(P, _LANE) * _LANE          # lane-granularity pad only
    R = P_pad // _LANE

    itemsize = jnp.dtype(preds.dtype).itemsize
    if block_rows is None:
        tr = _pick_block_rows(R, C, itemsize)
    else:
        # guard user-supplied tile rows: full extent or a multiple of 8
        tr = R if int(block_rows) >= R else max(8, (int(block_rows) // 8) * 8)

    num_tiles = pl.cdiv(R, tr)
    # Row-group split so odd/small batches still use both v7x TensorCores.
    G = 2 if (N % 2 == 1 and num_tiles % 2 == 0 and num_tiles >= 2) else 1
    T = num_tiles // G
    needs_mask = (num_tiles * tr * _LANE != P)

    preds_f = preds.reshape(N, C, P)
    tgt_f = targets.reshape(N, P)
    pad = P_pad - P
    if pad:
        # A pad copy happens anyway -> fold the int8 target downcast into it.
        tgt_dtype = jnp.int8 if (C <= 127 and tr % 32 == 0) else jnp.int32
        preds_f = jnp.pad(preds_f, ((0, 0), (0, 0), (0, pad)))
        tgt_f = jnp.pad(tgt_f.astype(tgt_dtype), ((0, 0), (0, pad)))
    else:
        # No pad pass: read int32 straight from HBM (avoid an extra astype pass).
        if tgt_f.dtype != jnp.int32 and not (tgt_f.dtype == jnp.int8 and tr % 32 == 0):
            tgt_f = tgt_f.astype(jnp.int32)

    preds_r = preds_f.reshape(N, C, R, _LANE)
    tgt_r = tgt_f.reshape(N, R, _LANE)

    kernel = _make_kernel(C, T, tr, P, needs_mask)

    partials = pl.pallas_call(
        kernel,
        out_shape=jax.ShapeDtypeStruct((N, G, 3, _LANE), jnp.float32),
        grid_spec=pltpu.PrefetchScalarGridSpec(
            num_scalar_prefetch=0,
            grid=(N, G, T),
            in_specs=[
                pl.BlockSpec((None, C, tr, _LANE),
                             lambda n, g, r: (n, 0, g * T + r, 0)),
                pl.BlockSpec((None, tr, _LANE),
                             lambda n, g, r: (n, g * T + r, 0)),
            ],
            out_specs=pl.BlockSpec((None, None, 3, _LANE),
                                   lambda n, g, r: (n, g, 0, 0)),
            scratch_shapes=[pltpu.VMEM((1, _LANE), jnp.float32)] * 3,
        ),
        compiler_params=pltpu.CompilerParams(
            dimension_semantics=("parallel", "parallel", "arbitrary"),
            vmem_limit_bytes=40 << 20),
    )(preds_r, tgt_r)

    totals = jnp.sum(partials, axis=(0, 1, 3))               # (3,): xe, inter, union
    xe_loss = totals[0] / (N * P)                             # CrossEntropyLoss (mean)
    dice_loss = 1.0 - 2.0 * totals[1] / (totals[2] + EPS)     # dice on softmax ch-1
    return alpha * xe_loss + (1.0 - alpha) * dice_loss


def _reference(preds, targets, alpha=0.5):
    # pure-JAX reference mirroring the PyTorch module semantics
    logp = jax.nn.log_softmax(preds.astype(jnp.float32), axis=1)
    onehot = jax.nn.one_hot(targets, preds.shape[1], axis=1)
    xe = -jnp.mean(jnp.sum(logp * onehot, axis=1))
    p1 = jax.nn.softmax(preds.astype(jnp.float32), axis=1)[:, 1]
    tf = targets.astype(jnp.float32)
    inter = jnp.sum(p1 * tf)
    union = jnp.sum(p1 + tf)
    dice = 1.0 - 2.0 * inter / (union + EPS)
    return alpha * xe + (1.0 - alpha) * dice


if __name__ == "__main__":
    key = jax.random.PRNGKey(0)
    ks = jax.random.split(key, 8)

    # Test 1: binary segmentation, aligned pixel count (C==2 fast path, no mask).
    N, C, H, W = 2, 2, 16, 16
    preds = jax.random.normal(ks[0], (N, C, H, W), dtype=jnp.float32)
    targets = jax.random.randint(ks[1], (N, H, W), 0, C, dtype=jnp.int32)
    loss = jax.block_until_ready(xe_dice_loss(preds, targets, alpha=0.5))
    ref = jax.block_until_ready(_reference(preds, targets, alpha=0.5))
    assert jnp.allclose(loss, ref, rtol=1e-5, atol=1e-5), (loss, ref)

    # Test 2: ragged pixel count + C>2 exercises lane padding + general-C path.
    N2, C2, H2, W2 = 1, 3, 7, 9
    preds2 = jax.random.normal(ks[2], (N2, C2, H2, W2), dtype=jnp.float32)
    targets2 = jax.random.randint(ks[3], (N2, H2, W2), 0, C2, dtype=jnp.int32)
    loss2 = jax.block_until_ready(xe_dice_loss(preds2, targets2, alpha=0.5))
    ref2 = jax.block_until_ready(_reference(preds2, targets2, alpha=0.5))
    assert jnp.allclose(loss2, ref2, rtol=1e-5, atol=1e-5), (loss2, ref2)

    # Test 3: multiple row tiles with a ragged (partial) last tile -> in-kernel mask.
    N3, C3, H3, W3 = 2, 2, 40, 128
    preds3 = jax.random.normal(ks[4], (N3, C3, H3, W3), dtype=jnp.float32)
    targets3 = jax.random.randint(ks[5], (N3, H3, W3), 0, C3, dtype=jnp.int32)
    loss3 = jax.block_until_ready(xe_dice_loss(preds3, targets3, block_rows=16))
    ref3 = jax.block_until_ready(_reference(preds3, targets3))
    assert jnp.allclose(loss3, ref3, rtol=1e-5, atol=1e-5), (loss3, ref3)

    # Test 4: N==1 with an even tile count exercises the G=2 row-group split.
    N4, C4, H4, W4 = 1, 2, 32, 128
    preds4 = jax.random.normal(ks[6], (N4, C4, H4, W4), dtype=jnp.float32)
    targets4 = jax.random.randint(ks[7], (N4, H4, W4), 0, C4, dtype=jnp.int32)
    loss4 = jax.block_until_ready(xe_dice_loss(preds4, targets4, block_rows=8))
    ref4 = jax.block_until_ready(_reference(preds4, targets4))
    assert jnp.allclose(loss4, ref4, rtol=1e-5, atol=1e-5), (loss4, ref4)

    print("KERNEL_OK")
</pallas_src>

<mosaic_0001>
module attributes {stable_mosaic.version = 11 : i64} {
  func.func @kernel(%arg0: i32, %arg1: i32, %arg2: i32, %arg3: memref<1x2x2x128xf32, #tpu.memory_space<vmem>>, %arg4: memref<1x2x128xi32, #tpu.memory_space<vmem>>, %arg5: memref<1x1x3x128xf32, #tpu.memory_space<vmem>>, %arg6: memref<1x128xf32, #tpu.memory_space<vmem>>, %arg7: memref<1x128xf32, #tpu.memory_space<vmem>>, %arg8: memref<1x128xf32, #tpu.memory_space<vmem>>) attributes {dimension_semantics = [#tpu.dimension_semantics<parallel>, #tpu.dimension_semantics<parallel>, #tpu.dimension_semantics<arbitrary>], iteration_bounds = array<i64: 2, 1, 1>, scalar_prefetch = 0 : i64, scratch_operands = 3 : i64, tpu.core_type = #tpu.core_type<tc>, window_params = [{transform_indices = @transform_0, window_bounds = array<i64: 1, 2, 2, 128>}, {transform_indices = @transform_1, window_bounds = array<i64: 1, 2, 128>}, {transform_indices = @transform_2, window_bounds = array<i64: 1, 1, 3, 128>}]} {
    %c0_i32 = arith.constant 0 : i32
    %0 = arith.cmpi eq, %arg2, %c0_i32 : i32
    %1 = arith.extui %0 : i1 to i32
    %c0_i32_0 = arith.constant 0 : i32
    %2 = arith.cmpi ne, %1, %c0_i32_0 : i32
    scf.if %2 {
      %cst_29 = arith.constant 0.000000e+00 : f32
      %45 = vector.broadcast %cst_29 : f32 to vector<1x128xf32>
      %c0_30 = arith.constant 0 : index
      %c0_31 = arith.constant 0 : index
      %46 = vector.load %arg6[%c0_30, %c0_31] : memref<1x128xf32, #tpu.memory_space<vmem>>, vector<1x128xf32>
      tpu.vector_store %arg6[%c0_30, %c0_31], %45 {strides = array<i32>} : memref<1x128xf32, #tpu.memory_space<vmem>>, vector<1x128xf32>,
      %cst_32 = arith.constant 0.000000e+00 : f32
      %47 = vector.broadcast %cst_32 : f32 to vector<1x128xf32>
      %c0_33 = arith.constant 0 : index
      %c0_34 = arith.constant 0 : index
      %48 = vector.load %arg7[%c0_33, %c0_34] : memref<1x128xf32, #tpu.memory_space<vmem>>, vector<1x128xf32>
      tpu.vector_store %arg7[%c0_33, %c0_34], %47 {strides = array<i32>} : memref<1x128xf32, #tpu.memory_space<vmem>>, vector<1x128xf32>,
      %cst_35 = arith.constant 0.000000e+00 : f32
      %49 = vector.broadcast %cst_35 : f32 to vector<1x128xf32>
      %c0_36 = arith.constant 0 : index
      %c0_37 = arith.constant 0 : index
      %50 = vector.load %arg8[%c0_36, %c0_37] : memref<1x128xf32, #tpu.memory_space<vmem>>, vector<1x128xf32>
      tpu.vector_store %arg8[%c0_36, %c0_37], %49 {strides = array<i32>} : memref<1x128xf32, #tpu.memory_space<vmem>>, vector<1x128xf32>,
    } else {
    }
    %c0 = arith.constant 0 : index
    %c0_1 = arith.constant 0 : index
    %c0_2 = arith.constant 0 : index
    %3 = vector.load %arg4[%c0, %c0_1, %c0_2] : memref<1x2x128xi32, #tpu.memory_space<vmem>>, vector<1x2x128xi32>
    %4 = vector.shape_cast %3 : vector<1x2x128xi32> to vector<2x128xi32>
    %5 = arith.sitofp %4 : vector<2x128xi32> to vector<2x128xf32>
    %c0_3 = arith.constant 0 : index
    %c1 = arith.constant 1 : index
    %c0_4 = arith.constant 0 : index
    %c0_5 = arith.constant 0 : index
    %6 = vector.load %arg3[%c0_3, %c1, %c0_4, %c0_5] : memref<1x2x2x128xf32, #tpu.memory_space<vmem>>, vector<1x1x2x128xf32>
    %7 = vector.shape_cast %6 : vector<1x1x2x128xf32> to vector<2x128xf32>
    %c0_6 = arith.constant 0 : index
    %c0_7 = arith.constant 0 : index
    %c0_8 = arith.constant 0 : index
    %c0_9 = arith.constant 0 : index
    %8 = vector.load %arg3[%c0_6, %c0_7, %c0_8, %c0_9] : memref<1x2x2x128xf32, #tpu.memory_space<vmem>>, vector<1x1x2x128xf32>
    %9 = vector.shape_cast %8 : vector<1x1x2x128xf32> to vector<2x128xf32>
    %10 = arith.subf %7, %9 : vector<2x128xf32>
    %cst = arith.constant 0.000000e+00 : f32
    %11 = vector.broadcast %cst : f32 to vector<2x128xf32>
    %12 = arith.maximumf %10, %11 : vector<2x128xf32>
    %13 = math.absf %10 : vector<2x128xf32>
    %cst_10 = arith.constant 0.000000e+00 : f32
    %14 = vector.broadcast %cst_10 : f32 to vector<2x128xf32>
    %15 = arith.subf %14, %13 : vector<2x128xf32>
    %16 = math.exp %15 : vector<2x128xf32>
    %cst_11 = arith.constant 1.000000e+00 : f32
    %17 = vector.broadcast %cst_11 : f32 to vector<2x128xf32>
    %18 = arith.addf %17, %16 : vector<2x128xf32>
    %19 = math.log %18 : vector<2x128xf32>
    %20 = arith.addf %12, %19 : vector<2x128xf32>
    %21 = arith.mulf %5, %10 : vector<2x128xf32>
    %22 = arith.subf %20, %21 : vector<2x128xf32>
    %23 = arith.subf %10, %20 : vector<2x128xf32>
    %24 = math.exp %23 : vector<2x128xf32>
    %25 = arith.addf %24, %5 : vector<2x128xf32>
    %26 = arith.mulf %24, %5 : vector<2x128xf32>
    %c0_12 = arith.constant 0 : index
    %c0_13 = arith.constant 0 : index
    %27 = vector.load %arg6[%c0_12, %c0_13] : memref<1x128xf32, #tpu.memory_space<vmem>>, vector<1x128xf32>
    %cst_14 = arith.constant dense<0.000000e+00> : vector<128xf32>
    %28 = vector.multi_reduction <add>, %22, %cst_14 [0] : vector<2x128xf32> to vector<128xf32>
    %29 = vector.shape_cast %28 : vector<128xf32> to vector<1x128xf32>
    %30 = arith.addf %27, %29 : vector<1x128xf32>
    %c0_15 = arith.constant 0 : index
    %c0_16 = arith.constant 0 : index
    %31 = vector.load %arg6[%c0_15, %c0_16] : memref<1x128xf32, #tpu.memory_space<vmem>>, vector<1x128xf32>
    tpu.vector_store %arg6[%c0_15, %c0_16], %30 {strides = array<i32>} : memref<1x128xf32, #tpu.memory_space<vmem>>, vector<1x128xf32>,
    %c0_17 = arith.constant 0 : index
    %c0_18 = arith.constant 0 : index
    %32 = vector.load %arg7[%c0_17, %c0_18] : memref<1x128xf32, #tpu.memory_space<vmem>>, vector<1x128xf32>
    %cst_19 = arith.constant dense<0.000000e+00> : vector<128xf32>
    %33 = vector.multi_reduction <add>, %26, %cst_19 [0] : vector<2x128xf32> to vector<128xf32>
    %34 = vector.shape_cast %33 : vector<128xf32> to vector<1x128xf32>
    %35 = arith.addf %32, %34 : vector<1x128xf32>
    %c0_20 = arith.constant 0 : index
    %c0_21 = arith.constant 0 : index
    %36 = vector.load %arg7[%c0_20, %c0_21] : memref<1x128xf32, #tpu.memory_space<vmem>>, vector<1x128xf32>
    tpu.vector_store %arg7[%c0_20, %c0_21], %35 {strides = array<i32>} : memref<1x128xf32, #tpu.memory_space<vmem>>, vector<1x128xf32>,
    %c0_22 = arith.constant 0 : index
    %c0_23 = arith.constant 0 : index
    %37 = vector.load %arg8[%c0_22, %c0_23] : memref<1x128xf32, #tpu.memory_space<vmem>>, vector<1x128xf32>
    %cst_24 = arith.constant dense<0.000000e+00> : vector<128xf32>
    %38 = vector.multi_reduction <add>, %25, %cst_24 [0] : vector<2x128xf32> to vector<128xf32>
    %39 = vector.shape_cast %38 : vector<128xf32> to vector<1x128xf32>
    %40 = arith.addf %37, %39 : vector<1x128xf32>
    %c0_25 = arith.constant 0 : index
    %c0_26 = arith.constant 0 : index
    %41 = vector.load %arg8[%c0_25, %c0_26] : memref<1x128xf32, #tpu.memory_space<vmem>>, vector<1x128xf32>
    tpu.vector_store %arg8[%c0_25, %c0_26], %40 {strides = array<i32>} : memref<1x128xf32, #tpu.memory_space<vmem>>, vector<1x128xf32>,
    %c0_i32_27 = arith.constant 0 : i32
    %42 = arith.cmpi eq, %arg2, %c0_i32_27 : i32
    %43 = arith.extui %42 : i1 to i32
    %c0_i32_28 = arith.constant 0 : i32
    %44 = arith.cmpi ne, %43, %c0_i32_28 : i32
    scf.if %44 {
      %c0_29 = arith.constant 0 : index
      %c0_30 = arith.constant 0 : index
      %45 = vector.load %arg6[%c0_29, %c0_30] : memref<1x128xf32, #tpu.memory_space<vmem>>, vector<1x128xf32>
      %c0_31 = arith.constant 0 : index
      %c0_32 = arith.constant 0 : index
      %c0_33 = arith.constant 0 : index
      %c0_34 = arith.constant 0 : index
      %46 = vector.load %arg5[%c0_31, %c0_32, %c0_33, %c0_34] : memref<1x1x3x128xf32, #tpu.memory_space<vmem>>, vector<1x1x1x128xf32>
      %47 = vector.shape_cast %46 : vector<1x1x1x128xf32> to vector<1x128xf32>
      %48 = vector.shape_cast %45 : vector<1x128xf32> to vector<1x1x1x128xf32>
      tpu.vector_store %arg5[%c0_31, %c0_32, %c0_33, %c0_34], %48 {strides = array<i32>} : memref<1x1x3x128xf32, #tpu.memory_space<vmem>>, vector<1x1x1x128xf32>,
      %c0_35 = arith.constant 0 : index
      %c0_36 = arith.constant 0 : index
      %49 = vector.load %arg7[%c0_35, %c0_36] : memref<1x128xf32, #tpu.memory_space<vmem>>, vector<1x128xf32>
      %c0_37 = arith.constant 0 : index
      %c0_38 = arith.constant 0 : index
      %c1_39 = arith.constant 1 : index
      %c0_40 = arith.constant 0 : index
      %50 = vector.load %arg5[%c0_37, %c0_38, %c1_39, %c0_40] : memref<1x1x3x128xf32, #tpu.memory_space<vmem>>, vector<1x1x1x128xf32>
      %51 = vector.shape_cast %50 : vector<1x1x1x128xf32> to vector<1x128xf32>
      %52 = vector.shape_cast %49 : vector<1x128xf32> to vector<1x1x1x128xf32>
      tpu.vector_store %arg5[%c0_37, %c0_38, %c1_39, %c0_40], %52 {strides = array<i32>} : memref<1x1x3x128xf32, #tpu.memory_space<vmem>>, vector<1x1x1x128xf32>,
      %c0_41 = arith.constant 0 : index
      %c0_42 = arith.constant 0 : index
      %53 = vector.load %arg8[%c0_41, %c0_42] : memref<1x128xf32, #tpu.memory_space<vmem>>, vector<1x128xf32>
      %c0_43 = arith.constant 0 : index
      %c0_44 = arith.constant 0 : index
      %c2 = arith.constant 2 : index
      %c0_45 = arith.constant 0 : index
      %54 = vector.load %arg5[%c0_43, %c0_44, %c2, %c0_45] : memref<1x1x3x128xf32, #tpu.memory_space<vmem>>, vector<1x1x1x128xf32>
      %55 = vector.shape_cast %54 : vector<1x1x1x128xf32> to vector<1x128xf32>
      %56 = vector.shape_cast %53 : vector<1x128xf32> to vector<1x1x1x128xf32>
      tpu.vector_store %arg5[%c0_43, %c0_44, %c2, %c0_45], %56 {strides = array<i32>} : memref<1x1x3x128xf32, #tpu.memory_space<vmem>>, vector<1x1x1x128xf32>,
    } else {
    }
    return
  }
  func.func @transform_0(%arg0: i32, %arg1: i32, %arg2: i32) -> (i32, i32, i32, i32) {
    %c1_i32 = arith.constant 1 : i32
    %0 = arith.muli %arg1, %c1_i32 : i32
    %1 = arith.addi %0, %arg2 : i32
    %c0_i32 = arith.constant 0 : i32
    %c0_i32_0 = arith.constant 0 : i32
    %c0_i32_1 = arith.constant 0 : i32
    return %arg0, %c0_i32, %1, %c0_i32_0 : i32, i32, i32, i32
  }
  func.func @transform_1(%arg0: i32, %arg1: i32, %arg2: i32) -> (i32, i32, i32) {
    %c1_i32 = arith.constant 1 : i32
    %0 = arith.muli %arg1, %c1_i32 : i32
    %1 = arith.addi %0, %arg2 : i32
    %c0_i32 = arith.constant 0 : i32
    %c0_i32_0 = arith.constant 0 : i32
    return %arg0, %1, %c0_i32 : i32, i32, i32
  }
  func.func @transform_2(%arg0: i32, %arg1: i32, %arg2: i32) -> (i32, i32, i32, i32) {
    %c0_i32 = arith.constant 0 : i32
    %c0_i32_0 = arith.constant 0 : i32
    %c0_i32_1 = arith.constant 0 : i32
    return %arg0, %arg1, %c0_i32, %c0_i32_0 : i32, i32, i32, i32
  }
}

</mosaic_0001>

<bundles_post_ra>
// kernel: tpu_custom_call.1
= control target key start
LH: loop header
LB: loop body
LE: loop exit
PB: predicated region body
PF: predicated region fallthrough
CT: control target
= control target key end

     0   :  { %7 = vsyncpa [#allocation6], 0  ;;  %s812_s0 = inlined_call_operand.hbm [shape: f32[2,2,2,128], index: 0, kind: input, shape index: {}]   ;;  %s813_s1 = inlined_call_operand.hbm [shape: s32[2,2,128], index: 1, kind: input, shape index: {}]   ;;  %s814_s2 = inlined_call_operand.vmem [shape: f32[2,1,3,128], index: 2, kind: output, shape index: {}]  }
   0x1   :  { %9 = vsyncpa [#allocation6 + $0x1], 0 }
   0x2   :  { %10 = vsyncpa [#allocation8], 0 }
   0x3   :  { %12 = vsyncpa [#allocation8 + $0x1], 0  ;;  %s645_s9 = smov 0   ;;  %s647_s10 = smov 0  }
   0x4   :  { %s649_s11 = smov 0   ;;  %s651_s12 = smov 0  }
   0x5   :  { %s653_s13 = smov 0   ;;  %s655_s14 = smov 0  }
   0x6 LB: > { %s423_s15 = sadd.s32 4294967295, %s623_s14   ;;  %s37_s16 = sadd.s32 1, %s619_s13  ;;  %s623_s14 = sphi %s655_s14, %s18_s14   ;;  %s619_s13 = sphi %s653_s13, %s826_s13   ;;  %s615_s12 = sphi %s651_s12, %s825_s12   ;;  %s611_s11 = sphi %s649_s11, %s824_s11   ;;  %s607_s10 = sphi %s647_s10, %s823_s10   ;;  %s603_s9 = sphi %s645_s9, %s822_s9  }
   0x7   : > { %p39_p0 = scmp.ge.s32.totalorder %s37_s16, 2  ;;  %s48_s17 = sadd.s32 1, %s611_s11 }
   0x8   : > { %p55_p1 = scmp.ne.s32.totalorder %s611_s11, %s607_s10  ;;  %p56_p2 = scmp.eq.s32.totalorder %s623_s14, 0 }
   0x9   : > { %s828_s16 = smov (%p39_p0, %s37_s16), 0  ;;  %p61_p4 = scmp.ne.s32.totalorder %s607_s10, %s603_s9 }
   0xa   : > { %p681_p3 = por %p56_p2, %p55_p1  ;;  %s43_s19 = ssub.s32 %s619_s13, %s828_s16 }
   0xb   : > { %p62_p5 = scmp.eq.s32.totalorder %s423_s15, 0  ;;  %p46_p6 = scmp.eq.s32.totalorder %s43_s19, 0 }
   0xc   : > { %p451_p8 = scmp.lt.s32.totalorder %s623_s14, 2  ;;  %s697_s22 = sand.u32 1, %s611_s11  }
   0xd   : > { %p688_p7 = por %p62_p5, %p61_p4  ;;  %s439_s23 = sshll.u32 %s619_s13, 6 }
   0xe   : > { %s694_s21 = scalar_select %p46_p6, %s611_s11, %s48_s17  }
   0xf   : > { %s817_s20 = scalar_select %p688_p7, 1, 0 }
  0x10   : > { %s427_s24 = sshll.u32 %s697_s22, 2  ;;  %s704_s27 = scalar_lea.hbm %s812_s0, %s439_s23 }
  0x11   : > { %s147_s28 = scalar_lea.vmem [#allocation5], %s427_s24  ;;  %p708_p9 = pnand %p451_p8, %p681_p3 }
  0x12   : > { %s156_s29 = sshll.u32 %s147_s28, 4  ;;  %s144_s3 = scalar_lea.sflag [#allocation6], %s697_s22  ;;  %s712_s29 = int_to_ptr.vmem [resolvable:$true] %s156_s29 }
  0x13   : > { %s509_s4 = scalar_lea.hbm %s704_s27, 64  ;;  %p511_p11 = pneg %p708_p9 }
  0x14   : > { %p510_p10 = scmp.ne.s32.totalorder %s704_s27, %s509_s4  ;;  %s514_s7 = scalar_lea.hbm %s812_s0, 128 }
  0x15   : > { %p515_p0 = scmp.lt.u32.totalorder %s704_s27, %s812_s0  ;;  %p516_p1 = scmp.lt.u32.totalorder %s514_s7, %s509_s4 }
  0x16   : > { %p512_p12 = pnand %p511_p11, %p510_p10  ;;  %p518_p3 = scmp.lt.u32.totalorder %s509_s4, %s704_s27 }
  0x17   : > { %p517_p2 = por %p516_p1, %p515_p0 }
  0x18   : > { %p513_p13 = pneg %p512_p12 }
  0x19   : > { %p519_p4 = por %p518_p3, %p517_p2 }
  0x1b   : > { %p520_p5 = pnand %p519_p4, %p513_p13 }
  0x1d   : > { %523 = shalt.err (!%p520_p5)
}
  0x1e   : > { %s524_s15 = scalar_lea.vmem %s712_s29, 64  ;;  %s625_s17 = smov [#allocation5]  }
  0x1f   : > { %p525_p6 = scmp.ne.s32.totalorder %s712_s29, %s524_s15  ;;  %s529_s18 = sshll.u32 %s625_s17, 4  ;;  %s530_s18 = int_to_ptr.vmem [resolvable:$false] %s529_s18 }
  0x20   : > { %s531_s19 = scalar_lea.vmem %s530_s18, 128  ;;  %p532_p12 = scmp.lt.s32.totalorder %s712_s29, %s530_s18 }
  0x21   : > { %p527_p8 = pnand %p525_p6, %p511_p11  ;;  %p533_p0 = scmp.lt.s32.totalorder %s531_s19, %s524_s15 }
  0x23   : > { %p528_p10 = pneg %p527_p8  ;;  %p534_p1 = por %p533_p0, %p532_p12 }
  0x25   : > { %p535_p2 = pnand %p534_p1, %p528_p10 }
  0x27   : > { %538 = shalt.err (!%p535_p2)
}
  0x28   : > { %s626_s23 = smov 32   ;;  %s627_s24 = smov 2  }
  0x29   : > { %447 = dma.hbm_to_vmem [thread:$0]  (!%p708_p9), %s704_s27, 64, %s712_s29, %s144_s3, %s626_s23, %s626_s23, %s627_s24  }
  0x2a   : > { %p432_p13 = scmp.ge.s32.totalorder %s623_s14, 1  ;;  %p184_p3 = scmp.lt.s32.totalorder %s623_s14, 3 }
  0x2b   : > { %s430_s25 = sshll.u32 %s697_s22, 1  ;;  %s431_s28 = sshll.u32 %s619_s13, 5 }
  0x2c   : > { %p745_p4 = pnand %p432_p13, %p184_p3  ;;  %s170_s4 = scalar_lea.vmem [#allocation7], %s430_s25 }
  0x2d   : > { %s179_s5 = sshll.u32 %s170_s4, 4  ;;  %s753_s8 = scalar_lea.hbm %s813_s1, %s431_s28  ;;  %s180_s5 = int_to_ptr.vmem [resolvable:$true] %s179_s5 }
  0x2e   : > { %s819_s26 = scalar_select %p745_p4, 1, 0 }
  0x2f   : > { %s167_s27 = scalar_lea.sflag [#allocation8], %s697_s22  ;;  %s539_s29 = scalar_lea.hbm %s753_s8, 32 }
  0x30   : > { %p540_p5 = scmp.ne.s32.totalorder %s753_s8, %s539_s29  ;;  %s544_s15 = scalar_lea.hbm %s813_s1, 64 }
  0x31   : > { %p545_p10 = scmp.lt.u32.totalorder %s753_s8, %s813_s1  ;;  %p546_p12 = scmp.lt.u32.totalorder %s544_s15, %s539_s29 }
  0x32   : > { %p542_p6 = pnand %p540_p5, %p511_p11  ;;  %p548_p1 = scmp.lt.u32.totalorder %s539_s29, %s753_s8 }
  0x33   : > { %p547_p0 = por %p546_p12, %p545_p10 }
  0x34   : > { %p543_p8 = pneg %p542_p6 }
  0x35   : > { %p549_p2 = por %p548_p1, %p547_p0 }
  0x37   : > { %p550_p13 = pnand %p549_p2, %p543_p8 }
  0x39   : > { %553 = shalt.err (!%p550_p13)
}
  0x3a   : > { %s554_s22 = scalar_lea.vmem %s180_s5, 32  ;;  %s628_s19 = smov [#allocation7]  }
  0x3b   : > { %p555_p3 = scmp.ne.s32.totalorder %s180_s5, %s554_s22  ;;  %s559_s23 = sshll.u32 %s628_s19, 4  ;;  %s560_s23 = int_to_ptr.vmem [resolvable:$false] %s559_s23 }
  0x3c   : > { %s561_s24 = scalar_lea.vmem %s560_s23, 64  ;;  %p562_p7 = scmp.lt.s32.totalorder %s180_s5, %s560_s23 }
  0x3d   : > { %p557_p5 = pnand %p555_p3, %p511_p11  ;;  %p563_p4 = scmp.lt.s32.totalorder %s561_s24, %s554_s22 }
  0x3f   : > { %p558_p6 = pneg %p557_p5  ;;  %p564_p10 = por %p563_p4, %p562_p7 }
  0x41   : > { %p565_p12 = pnand %p564_p10, %p558_p6 }
  0x43   : > { %568 = shalt.err (!%p565_p12)
}
  0x44   : > { %450 = dma.hbm_to_vmem [thread:$0]  (!%p708_p9), %s753_s8, 32, %s180_s5, %s167_s27  }
  0x45   : > { %p820_p8 = scmp.ne.s32.totalorder %s819_s26, 0 }
  0x46   : > { %s190_s25 = sand.u32 (!%p820_p8), 1, %s607_s10   ;;  %p821_p11 = scmp.ne.s32.totalorder (!%p820_p8), %s817_s20, 0 }
  0x47   : > { %188 = sbr.rel (%p820_p8) target bundleno = 160 (0xa0), region = 28  ;;  %s433_s28 = sshll.u32 (!%p820_p8), %s190_s25, 2 }
  0x48   : > { %s191_s4 = scalar_lea.sflag (!%p820_p8), [#allocation6], %s190_s25  ;;  %s194_s6 = scalar_lea.vmem (!%p820_p8), [#allocation5], %s433_s28 }
  0x4e   : > { %594 = dma.done.wait (%p821_p11), %s191_s4, 64  }
  0x4f   : > { %596 = vsyncadd (%p821_p11), %s191_s4, 4294967232  ;;  %s434_s7 = sshll.u32 %s190_s25, 1  ;;  %s200_s29 = scalar_lea.sflag [#allocation8], %s190_s25 }
  0x50   : > { %s203_s30 = scalar_lea.vmem [#allocation7], %s434_s7 }
  0x51   : > { %598 = dma.done.wait (%p821_p11), %s200_s29, 32  }
  0x52   : > { %600 = vsyncadd (%p821_p11), %s200_s29, 4294967264  ;;  %v629_v0 = vmov 0.0   ;;  %v436_v1 = vld [vmem:[%s194_s6 + $0x2] sm:$0x3]  ;;  %v251_v2 = vld [vmem:[%s194_s6] sm:$0x3] }
  0x53   : > { %244 = vst [vmem:[#allocation2] sm:$0x1] %v629_v0  ;;  %245 = vst [vmem:[#allocation3] sm:$0x1] %v629_v0  ;;  %v252_v3 = vsub.f32 %v436_v1, %v251_v2  ;;  %v247_v9 = vld [vmem:[%s203_s30] sm:$0x3] }
  0x54   : > { %246 = vst [vmem:[#allocation4] sm:$0x1] %v629_v0  ;;  %v248_v10 = vcvt.s32.f32 %v247_v9  ;;  %vm270_vm0 = vcmask 1041408   ;;  %p233_p7 = scmp.lt.s32.totalorder %s615_s12, 1 }
  0x55   : > { %v254_v4 = vand.u32 2147483647, %v252_v3  ;;  %v253_v11 = vmax.f32 %v252_v3, 0.0 }
  0x56   : > { %v262_v14 = vmul.f32 %v252_v3, %v248_v10  ;;  %s830_s12 = smov (!%p233_p7, %s615_s12), 1 }
  0x57   : > { %v255_v5 = vsub.f32 0.0, %v254_v4  ;;  %s435_s20 = sshll.u32 %s830_s12, 2 }
  0x58   : > { %s239_s8 = scalar_lea.vmem %s814_s2, %s435_s20 }
  0x59   : > { %v256_v6 = vmul.f32 1.442695, %v255_v5 }
  0x5a   : > { %v269_v25 = vld [vmem:[#allocation2] sm:$0x1]  ;;  %v280_v44 = vld [vmem:[#allocation3] sm:$0x1] }
  0x5b   : > { %503 = vpow2.f32 %v256_v6  ;;  %v290_v45 = vld [vmem:[#allocation4] sm:$0x1] }
  0x65   : > { %v504_v7 = vpop.eup %503 }
  0x66   : > { %v258_v8 = vadd.f32 1.0, %v504_v7 }
  0x68   : > { %505 = vlog2.f32 %v258_v8 }
  0x72   : > { %v506_v12 = vpop.eup %505 }
  0x73   : > { %v260_v13 = vmul.f32 0.6931472, %v506_v12 }
  0x75   : > { %v261_v15 = vadd.f32 %v260_v13, %v253_v11 }
  0x77   : > { %v263_v16 = vsub.f32 %v261_v15, %v262_v14  ;;  %v264_v17 = vsub.f32 %v252_v3, %v261_v15 }
  0x79   : > { %v265_v18 = vmul.f32 1.442695, %v264_v17  ;;  %v271_v19 = vsel %vm270_vm0, %v263_v16, 0.0 }
  0x7a   : > { %v272_v20 = vrot.slane %v271_v19, 4 }
  0x7b   : > { %507 = vpow2.f32 %v265_v18 }
  0x7c   : > { %v273_v21 = vadd.f32 %v272_v20, %v271_v19 }
  0x7e   : > { %v274_v22 = vrot.slane %v273_v21, 2 }
  0x80   : > { %v275_v23 = vadd.f32 %v274_v22, %v273_v21 }
  0x82   : > { %v276_v24 = vrot.slane %v275_v23, 1 }
  0x84   : > { %v277_v26 = vadd.f32 %v276_v24, %v275_v23 }
  0x85   : > { %v508_v27 = vpop.eup %507 }
  0x86   : > { %v278_v28 = vadd.f32 %v277_v26, %v269_v25  ;;  %v268_v29 = vmul.f32 %v508_v27, %v248_v10  ;;  %v267_v30 = vadd.f32 %v508_v27, %v248_v10 }
  0x88   : > { %279 = vst [vmem:[#allocation2] sm:$0x1] %v278_v28  ;;  %v281_v31 = vsel %vm270_vm0, %v268_v29, 0.0  ;;  %v291_v32 = vsel %vm270_vm0, %v267_v30, 0.0 }
  0x89   : > { %v282_v33 = vrot.slane %v281_v31, 4  ;;  %v292_v34 = vrot.slane %v291_v32, 4 }
  0x8b   : > { %v283_v35 = vadd.f32 %v282_v33, %v281_v31  ;;  %v293_v36 = vadd.f32 %v292_v34, %v291_v32 }
  0x8d   : > { %v284_v37 = vrot.slane %v283_v35, 2  ;;  %v294_v38 = vrot.slane %v293_v36, 2 }
  0x8f   : > { %v285_v39 = vadd.f32 %v284_v37, %v283_v35  ;;  %v295_v40 = vadd.f32 %v294_v38, %v293_v36  ;;  %v303_v41 = vld [vmem:[#allocation2] sm:$0x1] }
  0x90   : > { %304 = vst [vmem:[%s239_s8] sm:$0x1] %v303_v41 }
  0x91   : > { %v286_v42 = vrot.slane %v285_v39, 1  ;;  %v296_v43 = vrot.slane %v295_v40, 1 }
  0x93   : > { %v287_v46 = vadd.f32 %v286_v42, %v285_v39  ;;  %v297_v47 = vadd.f32 %v296_v43, %v295_v40 }
  0x95   : > { %v288_v48 = vadd.f32 %v287_v46, %v280_v44  ;;  %v298_v49 = vadd.f32 %v297_v47, %v290_v45 }
  0x97   : > { %289 = vst [vmem:[#allocation3] sm:$0x1] %v288_v48  ;;  %299 = vst [vmem:[#allocation4] sm:$0x1] %v298_v49 }
  0x9e   : > { %v305_v50 = vld [vmem:[#allocation3] sm:$0x1]  ;;  %v307_v51 = vld [vmem:[#allocation4] sm:$0x1] }
  0x9f   : > { %306 = vst [vmem:[%s239_s8 + $0x1] sm:$0x1] %v305_v50  ;;  %308 = vst [vmem:[%s239_s8 + $0x2] sm:$0x1] %v307_v51 }
  0xa0 PF: > { %s18_s14 = sadd.s32 1, %s623_s14   ;;  %s822_s9 = smov %s607_s10 }
  0xa1   : > { %p15_p9 = scmp.ge.s32.totalorder %s18_s14, 4   ;;  %s823_s10 = smov %s611_s11 }
  0xa2   : > { %s824_s11 = smov %s694_s21  ;;  %s825_s12 = smov %s619_s13 }
  0xa3   : > { %s826_s13 = smov %s828_s16  ;;  %17 = sbr.rel (!%p15_p9) target bundleno = 6 (0x6), region = 90 }
  0xaa   :  { %334 = vsyncpa [#allocation6], 1 }
  0xab   :  { %336 = vsyncpa [#allocation6 + $0x1], 1 }
  0xac   :  { %337 = vsyncpa [#allocation8], 1 }
  0xad   :  { %339 = vsyncpa [#allocation8 + $0x1], 1 }

</bundles_post_ra>
